<compile_context>
chip_gen: v6e
topology: v6e:2x2x1
jax: 0.10.0
libtpu: 0.0.40
codegen_flags: <defaults>
</compile_context>

<pallas_src>
import functools
import math

import jax
import jax.numpy as jnp
from jax import lax
from jax.experimental import pallas as pl
from jax.experimental.pallas import tpu as pltpu


def _round_up(x, m):
    return (x + m - 1) // m * m


def _round_down(x, m):
    return max(x, 0) // m * m


def _vmem_capacity_bytes():
    """Physical VMEM of the current TPU generation (v5e/v6e: 128 MiB, v7x: 64 MiB)."""
    try:
        info = pltpu.get_tpu_info()
        cap = getattr(info, "vmem_capacity_bytes", None)
        if cap:
            return int(cap)
    except Exception:
        pass
    return 64 * 1024 * 1024  # conservative fallback (v7x per-core VMEM)


def _gpm2d_kernel(inv_hw, inv_temp, num_pattern, out_planes,
                  x_ref, w1_ref, w2_ref, b2_ref, o_ref, acc_ref):
    """Grid = (b_blocks, hw_blocks); hw is the reduction ("arbitrary") axis.

    x_ref  : (blk_b, C, hw_blk)  float (f32/bf16) current tile of x
    w1_ref : (C, hidden)         f32   conv1 weight (pre-transposed)
    w2_ref : (hidden, PO_pad)    f32   conv2 weight (pre-transposed, lane-padded)
    b2_ref : (1, PO_pad)         f32   conv2 bias (lane-padded)
    o_ref  : (blk_b, PO_pad)     f32   softmax output (lane-dense)
    acc_ref: (blk_b, C, 128)     f32   lane-wide channel accumulator (VMEM scratch)
    """
    hw_idx = pl.program_id(1)

    # ---- init accumulator at the start of each batch-block's reduction ----
    @pl.when(hw_idx == 0)
    def _():
        acc_ref[...] = jnp.zeros_like(acc_ref)

    # ---- lane-wide partial sums: plain VPU adds per 128-lane group --------
    # (no per-step cross-lane reduce / relayout -> XLU stays off the hot path)
    n_groups = x_ref.shape[2] // 128
    if n_groups <= 16:
        for j in range(n_groups):
            acc_ref[...] += x_ref[:, :, j * 128:(j + 1) * 128].astype(jnp.float32)
    else:
        def body(j, carry):
            start = pl.multiple_of(j * 128, 128)
            acc_ref[...] += x_ref[:, :, pl.ds(start, 128)].astype(jnp.float32)
            return carry
        lax.fori_loop(0, n_groups, body, 0)

    # ---- finalize: mean -> conv1x1 -> ReLU -> conv1x1+bias -> softmax(P) ---
    @pl.when(hw_idx == pl.num_programs(1) - 1)
    def _():
        # single cross-lane reduce; mean uses true H*W so zero padding is safe
        pooled = jnp.sum(acc_ref[...], axis=2) * inv_hw          # (blk_b, C)
        h = jnp.dot(pooled, w1_ref[...], preferred_element_type=jnp.float32)
        h = jnp.maximum(h, 0.0)
        z = jnp.dot(h, w2_ref[...], preferred_element_type=jnp.float32)
        z = (z + b2_ref[...]) * inv_temp                         # (blk_b, PO_pad)

        # softmax over the pattern axis with O-wide static slices
        # (avoids the lane-splitting (bb, PO) -> (bb, P, O) reshape).
        P, O = num_pattern, out_planes
        cols = [z[:, p * O:(p + 1) * O] for p in range(P)]
        m = cols[0]
        for p in range(1, P):
            m = jnp.maximum(m, cols[p])
        es = [jnp.exp(c - m) for c in cols]
        denom = es[0]
        for p in range(1, P):
            denom = denom + es[p]
        inv_denom = pl.reciprocal(denom)                         # exact (approx=False)
        chunks = [e * inv_denom for e in es]

        po = P * O
        po_pad = o_ref.shape[1]
        if po_pad > po:                                          # keep the store lane-dense
            chunks.append(jnp.zeros((z.shape[0], po_pad - po), jnp.float32))
        o_ref[...] = jnp.concatenate(chunks, axis=1)


def _choose_tiles(B, C, hw, x_itemsize, po_pad, hidden, vmem_budget, hw_cap=None):
    """Auto-derive (blk_b, b_pad, hw_blk, hw_pad) from the VMEM budget.

    Preference order: grow hw_blk up to the full padded H*W (longest contiguous
    DMA rows, single reduction step), then grow the batch block in multiples of
    8 while keeping >= 2 parallel batch blocks (both TCs on v7x).
    """
    hw128 = _round_up(hw, 128)
    w_bytes = 2 * 4 * (C * hidden + hidden * po_pad + po_pad)    # resident, double-buffered

    def need(bb, hh, n_xbuf=2):
        x_t = bb * C * hh * x_itemsize
        acc = bb * C * 128 * 4
        out = 2 * bb * po_pad * 4
        return n_xbuf * x_t + acc + out + w_bytes

    # --- batch block --------------------------------------------------------
    if B <= 8:
        blk_b = B                      # single block == full batch dim (layout-legal)
        can_grow_b = False
    else:
        blk_b = 8                      # multiples of 8 -> >= 2 blocks for megacore
        can_grow_b = True

    # --- HW block: grow first, up to the whole (padded) H*W -----------------
    spare = vmem_budget - need(blk_b, 0)
    hw_blk = _round_down(spare // max(2 * blk_b * C * x_itemsize, 1), 128)
    hw_blk = max(min(hw_blk, hw128), 128)
    if hw_cap is not None:
        hw_blk = min(hw_blk, _round_up(max(hw_cap, 128), 128))

    # --- then grow the batch block while the whole HW still fits ------------
    if can_grow_b and hw_cap is None and hw_blk == hw128:
        target_tile = 16 * 1024 * 1024
        while True:
            nb = blk_b * 2
            if _round_up(B, nb) // nb < 2:                       # keep both TCs fed
                break
            if need(nb, hw_blk) > vmem_budget:
                break
            if nb * C * hw_blk * x_itemsize > target_tile:
                break
            blk_b = nb

    b_pad = _round_up(B, blk_b)
    hw_pad = _round_up(hw, hw_blk)
    return blk_b, b_pad, hw_blk, hw_pad


def gpm2d_forward(x, w1, w2, b2, *, temperature, num_pattern, out_planes,
                  hw_block=None):
    """x: (B, C, H, W) float (f32 or bf16); w1: (hidden, C); w2: (P*O, hidden); b2: (P*O,).
    Returns (B, num_pattern, out_planes, 1, 1, 1) f32."""
    B, C, H, W = x.shape
    hw = H * W
    PO = num_pattern * out_planes
    hidden = w1.shape[0]
    PO_pad = _round_up(PO, 128)                   # lane-dense epilogue / unmasked vst
    x_itemsize = jnp.dtype(x.dtype).itemsize

    # Hoist weight transposes and lane padding out of the kernel.
    w1_t = jnp.transpose(w1).astype(jnp.float32)                   # (C, hidden)
    w2_t = jnp.transpose(w2).astype(jnp.float32)                   # (hidden, PO)
    b2_f = b2.astype(jnp.float32)
    if PO_pad != PO:
        w2_t = jnp.pad(w2_t, ((0, 0), (0, PO_pad - PO)))
        b2_f = jnp.pad(b2_f, (0, PO_pad - PO))
    b2_2d = b2_f.reshape(1, PO_pad)

    # Generation-aware VMEM budget.
    cap = _vmem_capacity_bytes()
    budget = cap * 3 // 4

    blk_b, b_pad, hw_blk, hw_pad = _choose_tiles(
        B, C, hw, x_itemsize, PO_pad, hidden, budget, hw_cap=hw_block)

    # Lane-dense reduction layout (B, C, H*W); zero-pad HW / B so blocks tile exactly.
    x3 = x.reshape(B, C, hw)
    if hw_pad != hw:
        x3 = jnp.pad(x3, ((0, 0), (0, 0), (0, hw_pad - hw)))       # zeros: sum-safe
    if b_pad != B:
        x3 = jnp.pad(x3, ((0, b_pad - B), (0, 0), (0, 0)))

    n_hw_steps = hw_pad // hw_blk
    x_tile_bytes = blk_b * C * hw_blk * x_itemsize
    fixed_bytes = (blk_b * C * 128 * 4 + 2 * blk_b * PO_pad * 4
                   + 2 * 4 * (C * hidden + hidden * PO_pad + PO_pad))

    # Deepen prefetch only when per-step tiles are tiny and the reduction is long.
    n_xbuf = 2
    if n_hw_steps >= 4 and x_tile_bytes < (1 << 20):
        if 3 * x_tile_bytes + fixed_bytes <= budget:
            n_xbuf = 3

    x_map = lambda b, h: (b, 0, h)
    if n_xbuf == 3:
        x_spec = pl.BlockSpec((blk_b, C, hw_blk), x_map, pipeline_mode=pl.Buffered(3))
    else:
        x_spec = pl.BlockSpec((blk_b, C, hw_blk), x_map)

    grid = (b_pad // blk_b, n_hw_steps)

    kernel = functools.partial(
        _gpm2d_kernel,
        1.0 / float(hw), 1.0 / float(temperature),
        int(num_pattern), int(out_planes))

    # vmem limit from the actual tile math (+ headroom for Mosaic internal scratch).
    needed = n_xbuf * x_tile_bytes + fixed_bytes
    vmem_limit = min(cap * 9 // 10, max(needed + (8 << 20), 32 << 20))

    # Advisory cost: this op is HBM-bandwidth bound on reading x.
    cost = pl.CostEstimate(
        flops=int(b_pad * C * hw_pad + 2 * b_pad * C * hidden
                  + 2 * b_pad * hidden * PO_pad),
        transcendentals=int(b_pad * PO),
        bytes_accessed=int(x3.size * x_itemsize
                           + 4 * (w1_t.size + w2_t.size + b2_2d.size + b_pad * PO_pad)),
    )

    out2d = pl.pallas_call(
        kernel,
        out_shape=jax.ShapeDtypeStruct((b_pad, PO_pad), jnp.float32),
        grid_spec=pltpu.PrefetchScalarGridSpec(
            num_scalar_prefetch=0,
            grid=grid,
            in_specs=[
                x_spec,                                              # x tile
                pl.BlockSpec((C, hidden), lambda b, h: (0, 0)),      # w1 (resident)
                pl.BlockSpec((hidden, PO_pad), lambda b, h: (0, 0)),  # w2 (resident)
                pl.BlockSpec((1, PO_pad), lambda b, h: (0, 0)),      # bias (resident)
            ],
            # Same output block across the HW axis -> accumulator-resident output.
            out_specs=pl.BlockSpec((blk_b, PO_pad), lambda b, h: (b, 0)),
            scratch_shapes=[pltpu.VMEM((blk_b, C, 128), jnp.float32)],
        ),
        compiler_params=pltpu.CompilerParams(
            dimension_semantics=("parallel", "arbitrary"),
            vmem_limit_bytes=int(vmem_limit),
        ),
        cost_estimate=cost,
    )(x3, w1_t, w2_t, b2_2d)

    out2d = out2d[:B, :PO]
    # Trailing singleton dims to match PyTorch's .view(B, P, O, 1, 1, 1).
    return out2d.reshape(B, num_pattern, out_planes, 1, 1, 1)


def _kaiming_normal_fan_out(key, out_ch, in_ch):
    # nn.init.kaiming_normal_(w, mode='fan_out', nonlinearity='relu') for a 1x1 conv:
    # fan_out = out_ch, std = sqrt(2 / fan_out)
    std = math.sqrt(2.0 / out_ch)
    return std * jax.random.normal(key, (out_ch, in_ch), dtype=jnp.float32)


def _reference(x_f32, w1, w2, b2, temperature, num_pattern, out_planes):
    B = x_f32.shape[0]
    pooled = jnp.mean(x_f32, axis=(2, 3))
    h = jnp.maximum(pooled @ w1.T, 0.0)
    z = (h @ w2.T + b2) / temperature
    z3 = z.reshape(B, num_pattern, out_planes)
    return jax.nn.softmax(z3, axis=1).reshape(B, num_pattern, out_planes, 1, 1, 1)


if __name__ == "__main__":
    # module hyper-params (consistent with the reference __init__)
    in_planes = 4
    out_planes = 8
    ratios = 0.25
    temperature = 4.0
    num_pattern = 4
    # kernel_size is stored but unused in forward.

    hidden_planes = int(in_planes * ratios) + 1 if in_planes != 3 else num_pattern

    key = jax.random.PRNGKey(0)
    kx, kw1, kw2, kb = jax.random.split(key, 4)

    B, H, W = 2, 16, 16
    x = jax.random.normal(kx, (B, in_planes, H, W), dtype=jnp.float32)

    # deterministic parameters (kaiming-normal fan_out; small nonzero bias to
    # exercise the bias-add path — module init would zero it)
    w1 = _kaiming_normal_fan_out(kw1, hidden_planes, in_planes)                  # (hidden, C)
    w2 = _kaiming_normal_fan_out(kw2, num_pattern * out_planes, hidden_planes)   # (P*O, hidden)
    b2 = 0.05 * jax.random.normal(kb, (num_pattern * out_planes,), dtype=jnp.float32)

    ref = _reference(x, w1, w2, b2, temperature, num_pattern, out_planes)

    # 1) auto-derived tiles (whole H*W in one reduction step)
    out_auto = jax.block_until_ready(gpm2d_forward(
        x, w1, w2, b2,
        temperature=temperature, num_pattern=num_pattern, out_planes=out_planes))
    assert out_auto.shape == (B, num_pattern, out_planes, 1, 1, 1)
    assert bool(jnp.allclose(jnp.sum(out_auto, axis=1), 1.0, atol=1e-5))
    assert bool(jnp.allclose(out_auto, ref, atol=1e-5, rtol=1e-5))

    # 2) forced hw_block=128 -> 2 reduction steps: exercises the accumulator path
    out_multi = jax.block_until_ready(gpm2d_forward(
        x, w1, w2, b2,
        temperature=temperature, num_pattern=num_pattern, out_planes=out_planes,
        hw_block=128))
    assert bool(jnp.allclose(out_multi, ref, atol=1e-5, rtol=1e-5))

    # 3) bf16 input (halves dominant HBM traffic); f32 accumulation inside kernel
    x_bf16 = x.astype(jnp.bfloat16)
    ref_bf16 = _reference(x_bf16.astype(jnp.float32), w1, w2, b2,
                          temperature, num_pattern, out_planes)
    out_bf16 = jax.block_until_ready(gpm2d_forward(
        x_bf16, w1, w2, b2,
        temperature=temperature, num_pattern=num_pattern, out_planes=out_planes))
    assert bool(jnp.allclose(out_bf16, ref_bf16, atol=1e-4, rtol=1e-4))

    print("KERNEL_OK")
</pallas_src>

<mosaic_0001>
module attributes {stable_mosaic.version = 11 : i64} {
  func.func @_gpm2d_kernel(%arg0: i32, %arg1: i32, %arg2: memref<2x4x256xf32, #tpu.memory_space<vmem>>, %arg3: memref<4x2xf32, #tpu.memory_space<vmem>>, %arg4: memref<2x128xf32, #tpu.memory_space<vmem>>, %arg5: memref<1x128xf32, #tpu.memory_space<vmem>>, %arg6: memref<2x128xf32, #tpu.memory_space<vmem>>, %arg7: memref<2x4x128xf32, #tpu.memory_space<vmem>>) attributes {dimension_semantics = [#tpu.dimension_semantics<parallel>, #tpu.dimension_semantics<arbitrary>], iteration_bounds = array<i64: 1, 1>, scalar_prefetch = 0 : i64, scratch_operands = 1 : i64, tpu.core_type = #tpu.core_type<tc>, window_params = [{transform_indices = @transform_0, window_bounds = array<i64: 2, 4, 256>}, {pipeline_mode = #tpu.pipeline_mode<synchronous>, transform_indices = @transform_1, window_bounds = array<i64: 4, 2>}, {pipeline_mode = #tpu.pipeline_mode<synchronous>, transform_indices = @transform_2, window_bounds = array<i64: 2, 128>}, {pipeline_mode = #tpu.pipeline_mode<synchronous>, transform_indices = @transform_3, window_bounds = array<i64: 1, 128>}, {transform_indices = @transform_4, window_bounds = array<i64: 2, 128>}]} {
    %c0_i32 = arith.constant 0 : i32
    %0 = arith.cmpi eq, %arg1, %c0_i32 : i32
    %1 = arith.extui %0 : i1 to i32
    %c0_i32_0 = arith.constant 0 : i32
    %2 = arith.cmpi ne, %1, %c0_i32_0 : i32
    scf.if %2 {
      %cst = arith.constant 0.000000e+00 : f32
      %14 = vector.broadcast %cst : f32 to vector<2x4x128xf32>
      %c0_19 = arith.constant 0 : index
      %c0_20 = arith.constant 0 : index
      %c0_21 = arith.constant 0 : index
      %15 = vector.load %arg7[%c0_19, %c0_20, %c0_21] : memref<2x4x128xf32, #tpu.memory_space<vmem>>, vector<2x4x128xf32>
      tpu.vector_store %arg7[%c0_19, %c0_20, %c0_21], %14 {strides = array<i32>} : memref<2x4x128xf32, #tpu.memory_space<vmem>>, vector<2x4x128xf32>,
    } else {
    }
    %c0 = arith.constant 0 : index
    %c0_1 = arith.constant 0 : index
    %c0_2 = arith.constant 0 : index
    %3 = vector.load %arg7[%c0, %c0_1, %c0_2] : memref<2x4x128xf32, #tpu.memory_space<vmem>>, vector<2x4x128xf32>
    %c0_3 = arith.constant 0 : index
    %c0_4 = arith.constant 0 : index
    %c0_5 = arith.constant 0 : index
    %4 = vector.load %arg2[%c0_3, %c0_4, %c0_5] : memref<2x4x256xf32, #tpu.memory_space<vmem>>, vector<2x4x128xf32>
    %5 = arith.addf %3, %4 : vector<2x4x128xf32>
    %c0_6 = arith.constant 0 : index
    %c0_7 = arith.constant 0 : index
    %c0_8 = arith.constant 0 : index
    %6 = vector.load %arg7[%c0_6, %c0_7, %c0_8] : memref<2x4x128xf32, #tpu.memory_space<vmem>>, vector<2x4x128xf32>
    tpu.vector_store %arg7[%c0_6, %c0_7, %c0_8], %5 {strides = array<i32>} : memref<2x4x128xf32, #tpu.memory_space<vmem>>, vector<2x4x128xf32>,
    %c0_9 = arith.constant 0 : index
    %c0_10 = arith.constant 0 : index
    %c0_11 = arith.constant 0 : index
    %7 = vector.load %arg7[%c0_9, %c0_10, %c0_11] : memref<2x4x128xf32, #tpu.memory_space<vmem>>, vector<2x4x128xf32>
    %c0_12 = arith.constant 0 : index
    %c0_13 = arith.constant 0 : index
    %c128 = arith.constant 128 : index
    %8 = vector.load %arg2[%c0_12, %c0_13, %c128] : memref<2x4x256xf32, #tpu.memory_space<vmem>>, vector<2x4x128xf32>
    %9 = arith.addf %7, %8 : vector<2x4x128xf32>
    %c0_14 = arith.constant 0 : index
    %c0_15 = arith.constant 0 : index
    %c0_16 = arith.constant 0 : index
    %10 = vector.load %arg7[%c0_14, %c0_15, %c0_16] : memref<2x4x128xf32, #tpu.memory_space<vmem>>, vector<2x4x128xf32>
    tpu.vector_store %arg7[%c0_14, %c0_15, %c0_16], %9 {strides = array<i32>} : memref<2x4x128xf32, #tpu.memory_space<vmem>>, vector<2x4x128xf32>,
    %c0_i32_17 = arith.constant 0 : i32
    %11 = arith.cmpi eq, %arg1, %c0_i32_17 : i32
    %12 = arith.extui %11 : i1 to i32
    %c0_i32_18 = arith.constant 0 : i32
    %13 = arith.cmpi ne, %12, %c0_i32_18 : i32
    scf.if %13 {
      %c0_19 = arith.constant 0 : index
      %c0_20 = arith.constant 0 : index
      %c0_21 = arith.constant 0 : index
      %14 = vector.load %arg7[%c0_19, %c0_20, %c0_21] : memref<2x4x128xf32, #tpu.memory_space<vmem>>, vector<2x4x128xf32>
      %cst = arith.constant dense<0.000000e+00> : vector<2x4xf32>
      %15 = vector.multi_reduction <add>, %14, %cst [2] : vector<2x4x128xf32> to vector<2x4xf32>
      %cst_22 = arith.constant 3.906250e-03 : f32
      %16 = vector.broadcast %cst_22 : f32 to vector<2x4xf32>
      %17 = arith.mulf %15, %16 : vector<2x4xf32>
      %c0_23 = arith.constant 0 : index
      %c0_24 = arith.constant 0 : index
      %18 = vector.load %arg3[%c0_23, %c0_24] : memref<4x2xf32, #tpu.memory_space<vmem>>, vector<4x2xf32>
      %cst_25 = arith.constant dense<0.000000e+00> : vector<2x2xf32>
      %19 = tpu.matmul %17, %18, %cst_25 {dimension_numbers = #tpu.dot_dimension_numbers<[1], [0], [0], [1], [0, 0, 1, 1], [], []>} : vector<2x4xf32>, vector<4x2xf32>, vector<2x2xf32> -> vector<2x2xf32>
      %cst_26 = arith.constant 0.000000e+00 : f32
      %20 = vector.broadcast %cst_26 : f32 to vector<2x2xf32>
      %21 = arith.maximumf %19, %20 : vector<2x2xf32>
      %c0_27 = arith.constant 0 : index
      %c0_28 = arith.constant 0 : index
      %22 = vector.load %arg4[%c0_27, %c0_28] : memref<2x128xf32, #tpu.memory_space<vmem>>, vector<2x128xf32>
      %cst_29 = arith.constant dense<0.000000e+00> : vector<2x128xf32>
      %23 = tpu.matmul %21, %22, %cst_29 {dimension_numbers = #tpu.dot_dimension_numbers<[1], [0], [0], [1], [0, 0, 1, 1], [], []>} : vector<2x2xf32>, vector<2x128xf32>, vector<2x128xf32> -> vector<2x128xf32>
      %c0_30 = arith.constant 0 : index
      %c0_31 = arith.constant 0 : index
      %24 = vector.load %arg5[%c0_30, %c0_31] : memref<1x128xf32, #tpu.memory_space<vmem>>, vector<1x128xf32>
      %25 = vector.broadcast %24 : vector<1x128xf32> to vector<2x128xf32>
      %26 = arith.addf %23, %25 : vector<2x128xf32>
      %cst_32 = arith.constant 2.500000e-01 : f32
      %27 = vector.broadcast %cst_32 : f32 to vector<2x128xf32>
      %28 = arith.mulf %26, %27 : vector<2x128xf32>
      %29 = vector.extract_strided_slice %28 {offsets = [0, 0], sizes = [2, 8], strides = [1, 1]} : vector<2x128xf32> to vector<2x8xf32>
      %30 = vector.extract_strided_slice %28 {offsets = [0, 8], sizes = [2, 8], strides = [1, 1]} : vector<2x128xf32> to vector<2x8xf32>
      %31 = vector.extract_strided_slice %28 {offsets = [0, 16], sizes = [2, 8], strides = [1, 1]} : vector<2x128xf32> to vector<2x8xf32>
      %32 = vector.extract_strided_slice %28 {offsets = [0, 24], sizes = [2, 8], strides = [1, 1]} : vector<2x128xf32> to vector<2x8xf32>
      %33 = arith.maximumf %29, %30 : vector<2x8xf32>
      %34 = arith.maximumf %33, %31 : vector<2x8xf32>
      %35 = arith.maximumf %34, %32 : vector<2x8xf32>
      %36 = arith.subf %29, %35 : vector<2x8xf32>
      %37 = math.exp %36 : vector<2x8xf32>
      %38 = arith.subf %30, %35 : vector<2x8xf32>
      %39 = math.exp %38 : vector<2x8xf32>
      %40 = arith.subf %31, %35 : vector<2x8xf32>
      %41 = math.exp %40 : vector<2x8xf32>
      %42 = arith.subf %32, %35 : vector<2x8xf32>
      %43 = math.exp %42 : vector<2x8xf32>
      %44 = arith.addf %37, %39 : vector<2x8xf32>
      %45 = arith.addf %44, %41 : vector<2x8xf32>
      %46 = arith.addf %45, %43 : vector<2x8xf32>
      %47 = tpu.reciprocal %46 : vector<2x8xf32> -> vector<2x8xf32>
      %48 = arith.mulf %37, %47 : vector<2x8xf32>
      %49 = arith.mulf %39, %47 : vector<2x8xf32>
      %50 = arith.mulf %41, %47 : vector<2x8xf32>
      %51 = arith.mulf %43, %47 : vector<2x8xf32>
      %cst_33 = arith.constant 0.000000e+00 : f32
      %52 = vector.broadcast %cst_33 : f32 to vector<2x96xf32>
      %53 = tpu.concatenate %48, %49, %50, %51, %52 in 1 : vector<2x8xf32>, vector<2x8xf32>, vector<2x8xf32>, vector<2x8xf32>, vector<2x96xf32> -> vector<2x128xf32>
      %c0_34 = arith.constant 0 : index
      %c0_35 = arith.constant 0 : index
      %54 = vector.load %arg6[%c0_34, %c0_35] : memref<2x128xf32, #tpu.memory_space<vmem>>, vector<2x128xf32>
      tpu.vector_store %arg6[%c0_34, %c0_35], %53 {strides = array<i32>} : memref<2x128xf32, #tpu.memory_space<vmem>>, vector<2x128xf32>,
    } else {
    }
    return
  }
  func.func @transform_0(%arg0: i32, %arg1: i32) -> (i32, i32, i32) {
    %c0_i32 = arith.constant 0 : i32
    %c0_i32_0 = arith.constant 0 : i32
    return %arg0, %c0_i32, %arg1 : i32, i32, i32
  }
  func.func @transform_1(%arg0: i32, %arg1: i32) -> (i32, i32) {
    %c0_i32 = arith.constant 0 : i32
    %c0_i32_0 = arith.constant 0 : i32
    %c0_i32_1 = arith.constant 0 : i32
    return %c0_i32, %c0_i32_0 : i32, i32
  }
  func.func @transform_2(%arg0: i32, %arg1: i32) -> (i32, i32) {
    %c0_i32 = arith.constant 0 : i32
    %c0_i32_0 = arith.constant 0 : i32
    %c0_i32_1 = arith.constant 0 : i32
    return %c0_i32, %c0_i32_0 : i32, i32
  }
  func.func @transform_3(%arg0: i32, %arg1: i32) -> (i32, i32) {
    %c0_i32 = arith.constant 0 : i32
    %c0_i32_0 = arith.constant 0 : i32
    %c0_i32_1 = arith.constant 0 : i32
    return %c0_i32, %c0_i32_0 : i32, i32
  }
  func.func @transform_4(%arg0: i32, %arg1: i32) -> (i32, i32) {
    %c0_i32 = arith.constant 0 : i32
    %c0_i32_0 = arith.constant 0 : i32
    return %arg0, %c0_i32 : i32, i32
  }
}

</mosaic_0001>

<bundles_post_ra>
// kernel: tpu_custom_call.1
= control target key start
LH: loop header
LB: loop body
LE: loop exit
PB: predicated region body
PF: predicated region fallthrough
CT: control target
= control target key end

     0   :  { %9 = vsyncpa [#allocation4], 0  ;;  %s480_s0 = inlined_call_operand.hbm [shape: f32[2,4,256], index: 0, kind: input, shape index: {}]   ;;  %s481_s1 = inlined_call_operand.vmem [shape: f32[4,2], index: 1, kind: input, shape index: {}]   ;;  %s482_s2 = inlined_call_operand.vmem [shape: f32[2,128], index: 2, kind: input, shape index: {}]   ;;  %s483_s3 = inlined_call_operand.vmem [shape: f32[1,128], index: 3, kind: input, shape index: {}]   ;;  %s484_s4 = inlined_call_operand.hbm [shape: f32[2,128], index: 4, kind: output, shape index: {}]  }
   0x1   :  { %10 = vsyncpa [#allocation5], 0  ;;  %s420_s15 = smov [#allocation3]  }
   0x2   :  { %s16_s16 = sshll.u32 %s420_s15, 4  ;;  %s17_s16 = int_to_ptr.vmem [resolvable:$true] %s16_s16 }
   0x3   :  { %s384_s17 = scalar_lea.vmem %s17_s16, 256  ;;  %p389_p1 = scmp.lt.s32.totalorder %s17_s16, %s17_s16 }
   0x4   :  { %p385_p0 = scmp.ne.s32.totalorder %s17_s16, %s384_s17  ;;  %p390_p2 = scmp.lt.s32.totalorder %s384_s17, %s384_s17 }
   0x6   :  { %p391_p3 = por %p390_p2, %p389_p1 }
   0x8   :  { %p392_p4 = pnand %p391_p3, %p385_p0 }
   0xa   :  { %395 = shalt.err (!%p392_p4)
}
   0xb   :  { %s421_s18 = smov 128   ;;  %s422_s19 = smov 8  }
   0xc   :  { %22 = dma.hbm_to_vmem [thread:$0]  %s480_s0, 256, %s17_s16, [#allocation4], %s421_s18, %s421_s18, %s422_s19  }
   0xd   :  { %416 = dma.done.wait [#allocation4], 256  }
   0xe   :  { %417 = vsyncadd [#allocation4], 4294967040  ;;  %v423_v0 = vmov 0.0   ;;  %v40_v1 = vld [vmem:[#allocation3] sm:$0xf]  ;;  %vm59_vm0 = vcmask 1043456   ;;  %v71_v18 = vlaneseq }
   0xf   :  { %36 = vst [vmem:[#allocation2] sm:$0xf] %v423_v0  ;;  %37 = vst [vmem:[#allocation2 + $0x4] sm:$0xf] %v423_v0  ;;  %345 = vmatprep.subr.mxu0 %v423_v0  ;;  %350 = vmatprep.subr.mxu1 %v423_v0  ;;  %v41_v2 = vld [vmem:[#allocation3 + $0x8] sm:$0xf] }
  0x10   :  { %v48_v7 = vld [vmem:[#allocation3 + $0x4] sm:$0xf]  ;;  %v49_v8 = vld [vmem:[#allocation3 + $0xc] sm:$0xf]  ;;  %v68_v17 = vld [vmem:[%s481_s1] sm:$0xf] }
  0x11   :  { %346 = vmatpush3.msk.msra.mxu0 %vm59_vm0, %v68_v17  ;;  %vm424_vm1 = vmmov 0   ;;  %v72_v19 = vand.u32 127, %v71_v18  ;;  %v74_v20 = vshrl.u32 %v71_v18, 7  ;;  %vm81_vm2 = vcmask 1041409   ;;  %v160_v29 = vld [vmem:[%s482_s2] sm:$0x3] }
  0x12   :  { %347 = vmatprep.mubr.msk.f32.mxu0 %vm424_vm1, %v423_v0  ;;  %352 = vmatprep.mubr.msk.f32.mxu1 %vm424_vm1, %v423_v0  ;;  %vm83_vm3 = vcmask 31744   ;;  %vm172_vm4 = vcmask 1041408   ;;  %vm168_vm5 = vcmask 15360   ;;  %v338_v33 = vld [vmem:[%s483_s3] ss:$0 sm:$0xff]  ;;  %s425_s26 = smov 104  }
  0x13   :  { %v75_v22 = vsub.s32 %v72_v19, %v74_v20  ;;  %351 = vmatpush3.msk.msra.mxu1 %vm172_vm4, %v160_v29  ;;  %s426_s27 = smov 120   ;;  %s427_s2 = smov 112   ;;  %vm312_vm6 = vcmask 64512   ;;  %vm314_vm7 = vcmask 130048   ;;  %vm316_vm8 = vcmask 195584  }
  0x14   :  { %s428_s3 = smov 16   ;;  %s429_s28 = smov 24   ;;  %vm318_vm9 = vcmask 261120  }
  0x15   :  { %s430_s29 = smov [#allocation6]  }
  0x16   :  { %v38_v3 = vld [vmem:[#allocation2] sm:$0xf]  ;;  %v39_v4 = vld [vmem:[#allocation2 + $0x4] sm:$0xf]  ;;  %s327_s30 = sshll.u32 %s430_s29, 4  ;;  %s328_s30 = int_to_ptr.vmem [resolvable:$true] %s327_s30 }
  0x17   :  { %v42_v5 = vadd.f32 %v40_v1, %v38_v3  ;;  %v43_v6 = vadd.f32 %v41_v2, %v39_v4  ;;  %s396_s5 = scalar_lea.vmem %s328_s30, 32  ;;  %p401_p6 = scmp.lt.s32.totalorder %s328_s30, %s328_s30 }
  0x18   :  { %p397_p5 = scmp.ne.s32.totalorder %s328_s30, %s396_s5  ;;  %p402_p7 = scmp.lt.s32.totalorder %s396_s5, %s396_s5 }
  0x19   :  { %44 = vst [vmem:[#allocation2] sm:$0xf] %v42_v5  ;;  %45 = vst [vmem:[#allocation2 + $0x4] sm:$0xf] %v43_v6 }
  0x1a   :  { %p403_p8 = por %p402_p7, %p401_p6 }
  0x1c   :  { %p404_p9 = pnand %p403_p8, %p397_p5 }
  0x20   :  { %v46_v9 = vld [vmem:[#allocation2] sm:$0xf]  ;;  %v47_v10 = vld [vmem:[#allocation2 + $0x4] sm:$0xf] }
  0x21   :  { %v50_v11 = vadd.f32 %v48_v7, %v46_v9  ;;  %v51_v12 = vadd.f32 %v49_v8, %v47_v10 }
  0x23   :  { %52 = vst [vmem:[#allocation2] sm:$0xf] %v50_v11  ;;  %53 = vst [vmem:[#allocation2 + $0x4] sm:$0xf] %v51_v12 }
  0x2a   :  { %v57_v13 = vld [vmem:[#allocation2] sm:$0xf]  ;;  %v58_v14 = vld [vmem:[#allocation2 + $0x4] sm:$0xf] }
  0x2b   :  { %v60_v15 = vsel %vm59_vm0, %v57_v13, 0.0  ;;  %v63_v16 = vsel %vm59_vm0, %v58_v14, 0.0 }
  0x2c   :  { %61 = vadd.xlane.f32.xlu0 %v60_v15 }
  0x30   :  { %64 = vadd.xlane.f32.xlu0 %v63_v16 }
  0xb5   :  { %v62_v21 = vpop.xlane.xlu0 %61 }
  0xb6   :  { %v66_v23 = vmul.f32 0.00390625, %v62_v21 }
  0xb8   :  { %v76_v26 = vrot.slane %v66_v23, %v75_v22 }
  0xb9   :  { %v65_v24 = vpop.xlane.xlu0 %64 }
  0xba   :  { %v67_v25 = vmul.f32 0.00390625, %v65_v24 }
  0xbc   :  { %v80_v27 = vrot.slane %v67_v25, %v75_v22 }
  0xbe   :  { %v82_v28 = vsel %vm81_vm2, %v80_v27, %v76_v26 }
  0xbf   :  { %348 = vmatmul.mubr.msk.f32.vlgmr.msra.gmra.mxu0 %vm83_vm3, %v82_v28 }
 0x17f   :  { %v155_v30 = vpop.f32.mrf.mxu0 }
 0x180   :  { %v159_v31 = vmax.f32 %v155_v30, 0.0 }
 0x181   :  { %v349_v32 = vpop.f32.mrf.mxu0 }
 0x182   :  { %353 = vmatmul.mubr.msk.f32.vlgmr.msra.gmra.mxu1 %vm168_vm5, %v159_v31 }
 0x242   :  { %v242_v34 = vpop.f32.mrf.mxu1 }
 0x243   :  { %v243_v35 = vadd.f32 %v338_v33, %v242_v34 }
 0x244   :  { %v354_v36 = vpop.f32.mrf.mxu1 }
 0x245   :  { %v246_v37 = vmul.f32 0.25, %v243_v35 }
 0x247   :  { %256 = vrot.lane.b32.xlu0 %v246_v37, %s425_s26  ;;  %248 = vrot.lane.b32.xlu1 %v246_v37, %s426_s27 }
 0x24b   :  { %252 = vrot.lane.b32.xlu1 %v246_v37, %s427_s2 }
 0x2b9   :  { %v249_v38 = vpop.permute.xlu1 %248  ;;  %v257_v42 = vpop.permute.xlu0 %256 }
 0x2ba   :  { %v251_v39 = vmax.f32 %v246_v37, %v249_v38 }
 0x2bd   :  { %v253_v40 = vpop.permute.xlu1 %252 }
 0x2be   :  { %v255_v41 = vmax.f32 %v251_v39, %v253_v40 }
 0x2c0   :  { %v259_v43 = vmax.f32 %v255_v41, %v257_v42 }
 0x2c2   :  { %264 = vrot.lane.b32.xlu1 %v259_v43, %s422_s19  ;;  %v260_v56 = vsub.f32 %v246_v37, %v259_v43 }
 0x2c4   :  { %v261_v57 = vmul.f32 1.442695, %v260_v56 }
 0x2c6   :  { %270 = vrot.lane.b32.xlu1 %v259_v43, %s428_s3 }
 0x2ca   :  { %276 = vrot.lane.b32.xlu1 %v259_v43, %s429_s28 }
 0x334   :  { %v265_v44 = vpop.permute.xlu1 %264 }
 0x335   :  { %v267_v45 = vsub.f32 %v246_v37, %v265_v44 }
 0x337   :  { %v268_v46 = vmul.f32 1.442695, %v267_v45 }
 0x338   :  { %v271_v47 = vpop.permute.xlu1 %270 }
 0x339   :  { %366 = vpow2.f32 %v268_v46  ;;  %v273_v48 = vsub.f32 %v246_v37, %v271_v47 }
 0x33b   :  { %v274_v49 = vmul.f32 1.442695, %v273_v48 }
 0x33c   :  { %v277_v50 = vpop.permute.xlu1 %276 }
 0x33d   :  { %368 = vpow2.f32 %v274_v49  ;;  %v279_v51 = vsub.f32 %v246_v37, %v277_v50 }
 0x33f   :  { %v280_v52 = vmul.f32 1.442695, %v279_v51 }
 0x341   :  { %370 = vpow2.f32 %v280_v52 }
 0x342   :  { %372 = vpow2.f32 %v261_v57 }
 0x346   :  { %v367_v53 = vpop.eup %366 }
 0x347   :  { %283 = vrot.lane.b32.xlu1 %v367_v53, %s426_s27 }
 0x34a   :  { %v369_v54 = vpop.eup %368 }
 0x34b   :  { %288 = vrot.lane.b32.xlu1 %v369_v54, %s427_s2 }
 0x34e   :  { %v371_v55 = vpop.eup %370 }
 0x34f   :  { %293 = vrot.lane.b32.xlu1 %v371_v55, %s425_s26  ;;  %v373_v59 = vpop.eup %372 }
 0x3b9   :  { %v284_v58 = vpop.permute.xlu1 %283 }
 0x3ba   :  { %v286_v61 = vadd.f32 %v373_v59, %v284_v58 }
 0x3bd   :  { %v289_v60 = vpop.permute.xlu1 %288 }
 0x3be   :  { %v291_v62 = vadd.f32 %v289_v60, %v286_v61 }
 0x3c1   :  { %v294_v63 = vpop.permute.xlu1 %293 }
 0x3c2   :  { %v296_v0 = vadd.f32 %v294_v63, %v291_v62 }
 0x3c4   :  { %374 = vrcp.f32 %v296_v0 }
 0x3d1   :  { %v375_v1 = vpop.eup %374 }
 0x3d2   :  { %304 = vrot.lane.b32.xlu1 %v375_v1, %s428_s3  ;;  %300 = vrot.lane.b32.xlu0 %v375_v1, %s422_s19  ;;  %v298_v2 = vmul.f32 %v375_v1, %v373_v59 }
 0x3d6   :  { %308 = vrot.lane.b32.xlu0 %v375_v1, %s429_s28 }
 0x444   :  { %v305_v3 = vpop.permute.xlu1 %304  ;;  %v301_v4 = vpop.permute.xlu0 %300 }
 0x445   :  { %v303_v5 = vmul.f32 %v367_v53, %v301_v4  ;;  %v307_v6 = vmul.f32 %v369_v54, %v305_v3 }
 0x447   :  { %v313_v7 = vsel %vm312_vm6, %v298_v2, %v303_v5 }
 0x448   :  { %v309_v8 = vpop.permute.xlu0 %308  ;;  %v315_v10 = vsel %vm314_vm7, %v313_v7, %v307_v6 }
 0x449   :  { %v311_v9 = vmul.f32 %v371_v55, %v309_v8 }
 0x44b   :  { %v317_v11 = vsel %vm316_vm8, %v315_v10, %v311_v9 }
 0x44c   :  { %v319_v12 = vsel %vm318_vm9, %v317_v11, 0.0 }
 0x44d   :  { %320 = vst [vmem:[#allocation6] sm:$0x3] %v319_v12 }
 0x44e   :  { %407 = shalt.err (!%p404_p9)
}
 0x44f   :  { %330 = dma.vmem_to_hbm [thread:$0]  %s328_s30, 32, %s484_s4, [#allocation5]  }
 0x450   :  { %418 = dma.done.wait [#allocation5], 32  }
 0x451   :  { %419 = vsyncadd [#allocation5], 4294967264 }
 0x452   :  { %334 = vsyncpa [#allocation4], 1 }
 0x453   :  { %335 = vsyncpa [#allocation5], 1 }

</bundles_post_ra>
